<compile_context>
chip_gen: v6e
topology: v6e:2x2x1
jax: 0.10.0
libtpu: 0.0.40
codegen_flags: <defaults>
</compile_context>

<pallas_src>
import jax
import jax.numpy as jnp
from jax.experimental import pallas as pl
from jax.experimental.pallas import tpu as pltpu

# ---------------- model hyper-params (small, TPU-friendly) -----------------
N_NODES = 16   # number of graph nodes
F_IN = 4       # input node-feature dim
F_PAD = 8      # x padded to 8 features (zeros) so kernel slices stay 8-aligned
HIDDEN = 32    # hidden
OUT = 16       # output
LANES = 128    # everything inside the kernel is padded to 128 lanes

GAT_NEG_SLOPE = 0.2    # GATConv internal LeakyReLU slope (PyG default)
ACT_NEG_SLOPE = 0.01   # nn.LeakyReLU default slope (the model's `activation`)
NEG_INF = -1e30

# ---------------- packed parameter slab layout (rows, 128 lanes) -----------
R_W1 = 0                      # [F_PAD, 128]  rows 0:F_IN real, cols 0:HIDDEN real
R_W2 = R_W1 + F_PAD           # [128, 128]    rows/cols 0:HIDDEN real
R_OUTW = R_W2 + LANES         # [128, 128]    rows 0:HIDDEN, cols 0:OUT real
R_MW1 = R_OUTW + LANES        # [128, 128]    rows/cols 0:HIDDEN real
R_MW2 = R_MW1 + LANES         # [128, 128]    rows 0:HIDDEN, cols 0:OUT real
R_VEC = R_MW2 + LANES         # [16, 128]     per-row small vectors (below)
SLAB_ROWS = R_VEC + 16        # 536 (multiple of 8)

V_ASRC1, V_ADST1, V_B1 = 0, 1, 2
V_ASRC2, V_ADST2, V_B2 = 3, 4, 5
V_OUTB, V_VNEMB, V_MB1, V_MB2 = 6, 7, 8, 9


def _gat_aggregate(h, adj, a_src_row, a_dst_row, b_row, n):
    """Single-head GATConv aggregation on lane-padded features.

    h:          [n, 128] transformed node features (zeros beyond HIDDEN)
    adj:        [n, n]   dense mask, adj[dst, src] = 1 iff edge src->dst
    a_*_row:    [1, 128] attention vectors (zeros beyond HIDDEN)
    b_row:      [1, 128] bias row (zeros beyond HIDDEN)
    """
    dn = (((1,), (1,)), ((), ()))  # contract last dims (A @ B^T) -> MXU
    # e_dst[i] = <h_i, a_dst>
    e_dst = jax.lax.dot_general(h, a_dst_row, dn,
                                preferred_element_type=jnp.float32)        # [n, 1]
    # e_src broadcast along rows: e_src_b[i, j] = <h_j, a_src>  (MXU, no transpose)
    a_src_b = jnp.broadcast_to(a_src_row, (n, LANES))
    e_src_b = jax.lax.dot_general(a_src_b, h, dn,
                                  preferred_element_type=jnp.float32)      # [n, n]
    logits = e_dst + e_src_b                                               # [n, n]
    logits = jnp.where(logits > 0, logits, GAT_NEG_SLOPE * logits)
    # masked softmax over source nodes j (grouped by destination i)
    mask = adj > 0
    masked = jnp.where(mask, logits, NEG_INF)
    m = jnp.max(masked, axis=-1, keepdims=True)
    p = jnp.where(mask, jnp.exp(masked - m), 0.0)
    denom = jnp.sum(p, axis=-1, keepdims=True)
    inv = pl.reciprocal(jnp.maximum(denom, 1e-20), approx=True)            # EUP, guarded
    alpha = p * inv                                                        # [n, n]
    # aggregate messages + bias
    return jnp.dot(alpha, h, preferred_element_type=jnp.float32) + b_row   # [n, 128]


def gnn_vn_kernel(x_ref, adj_ref, slab_ref, out_ref):
    x = x_ref[...]                                   # [N, F_PAD]
    adj = adj_ref[...]                               # [N, N]
    n = x.shape[0]

    vecs = slab_ref[R_VEC:R_VEC + 16, :]             # [16, 128] all small vectors

    def row(i):
        return vecs[i:i + 1, :]                      # [1, 128]

    # out = self.initial(x, edge_index)              (no activation after initial)
    w1 = slab_ref[R_W1:R_W1 + F_PAD, :]              # [F_PAD, 128]
    h1 = jnp.dot(x, w1, preferred_element_type=jnp.float32)                # [N, 128]
    out1 = _gat_aggregate(h1, adj, row(V_ASRC1), row(V_ADST1), row(V_B1), n)

    # out = layer(out); out = LeakyReLU(out)         (single module_list layer)
    w2 = slab_ref[R_W2:R_W2 + LANES, :]              # [128, 128]
    h2 = jnp.dot(out1, w2, preferred_element_type=jnp.float32)             # [N, 128]
    out2 = _gat_aggregate(h2, adj, row(V_ASRC2), row(V_ADST2), row(V_B2), n)
    out2 = jnp.where(out2 > 0, out2, ACT_NEG_SLOPE * out2)

    # virtual node: global_add_pool(out, None, size=1) + Embedding(1, H)(0)
    vn = jnp.sum(out2, axis=0, keepdims=True) + row(V_VNEMB)               # [1, 128]
    # mlp_virtualnode: Lin(H,H)-ReLU-Lin(H,OUT)-ReLU  (VN does NOT feed back)
    mw1 = slab_ref[R_MW1:R_MW1 + LANES, :]
    mw2 = slab_ref[R_MW2:R_MW2 + LANES, :]
    vn = jnp.maximum(
        jnp.dot(vn, mw1, preferred_element_type=jnp.float32) + row(V_MB1), 0.0)
    vn = jnp.maximum(
        jnp.dot(vn, mw2, preferred_element_type=jnp.float32) + row(V_MB2), 0.0)

    # out = self.output(out)
    outw = slab_ref[R_OUTW:R_OUTW + LANES, :]
    node_out = jnp.dot(out2, outw, preferred_element_type=jnp.float32) + row(V_OUTB)

    # lane-dense output slab: rows 0:N node outputs, rows N:N+8 the VN vector
    out_ref[0:n, :] = node_out
    out_ref[n:n + 8, :] = jnp.broadcast_to(vn, (8, LANES))


@jax.jit
def gnn_final_vn_forward(x, adj, param_slab):
    n = x.shape[0]
    x_pad = jnp.pad(x, ((0, 0), (0, F_PAD - x.shape[1])))
    vmem = pl.BlockSpec(memory_space=pltpu.MemorySpace.VMEM)
    out_slab = pl.pallas_call(
        gnn_vn_kernel,
        out_shape=jax.ShapeDtypeStruct((n + 8, LANES), jnp.float32),
        in_specs=[vmem, vmem, vmem],
        out_specs=vmem,
    )(x_pad, adj, param_slab)
    node_out = out_slab[:n, :OUT]
    vn_out = out_slab[n:n + 1, :OUT]
    return node_out, vn_out


# ------------------------- host-side helpers --------------------------------
def make_params(key):
    ks = jax.random.split(key, 12)
    s = 0.1
    return {
        # initial GATConv(F_IN -> HIDDEN)
        "w1":       s * jax.random.normal(ks[0], (F_IN, HIDDEN), jnp.float32),
        "att_src1": s * jax.random.normal(ks[1], (1, HIDDEN), jnp.float32),
        "att_dst1": s * jax.random.normal(ks[2], (1, HIDDEN), jnp.float32),
        "b1":       jnp.zeros((1, HIDDEN), jnp.float32),
        # second GATConv(HIDDEN -> HIDDEN)
        "w2":       s * jax.random.normal(ks[3], (HIDDEN, HIDDEN), jnp.float32),
        "att_src2": s * jax.random.normal(ks[4], (1, HIDDEN), jnp.float32),
        "att_dst2": s * jax.random.normal(ks[5], (1, HIDDEN), jnp.float32),
        "b2":       jnp.zeros((1, HIDDEN), jnp.float32),
        # output Linear(HIDDEN -> OUT)
        "out_w":    s * jax.random.normal(ks[6], (HIDDEN, OUT), jnp.float32),
        "out_b":    s * jax.random.normal(ks[7], (1, OUT), jnp.float32),
        # virtualnode_embedding.weight initialized to 0 (per __init__)
        "vn_emb":   jnp.zeros((1, HIDDEN), jnp.float32),
        # virtual-node MLP: Lin(H,H)-ReLU-Lin(H,OUT)-ReLU
        "mlp_w1":   s * jax.random.normal(ks[8], (HIDDEN, HIDDEN), jnp.float32),
        "mlp_b1":   s * jax.random.normal(ks[9], (1, HIDDEN), jnp.float32),
        "mlp_w2":   s * jax.random.normal(ks[10], (HIDDEN, OUT), jnp.float32),
        "mlp_b2":   s * jax.random.normal(ks[11], (1, OUT), jnp.float32),
    }


def pack_params(p):
    """Pack every parameter into one lane-padded f32 slab [SLAB_ROWS, 128]."""
    slab = jnp.zeros((SLAB_ROWS, LANES), jnp.float32)
    slab = slab.at[R_W1:R_W1 + F_IN, :HIDDEN].set(p["w1"])
    slab = slab.at[R_W2:R_W2 + HIDDEN, :HIDDEN].set(p["w2"])
    slab = slab.at[R_OUTW:R_OUTW + HIDDEN, :OUT].set(p["out_w"])
    slab = slab.at[R_MW1:R_MW1 + HIDDEN, :HIDDEN].set(p["mlp_w1"])
    slab = slab.at[R_MW2:R_MW2 + HIDDEN, :OUT].set(p["mlp_w2"])
    vec_rows = [
        (V_ASRC1, p["att_src1"], HIDDEN), (V_ADST1, p["att_dst1"], HIDDEN),
        (V_B1, p["b1"], HIDDEN),
        (V_ASRC2, p["att_src2"], HIDDEN), (V_ADST2, p["att_dst2"], HIDDEN),
        (V_B2, p["b2"], HIDDEN),
        (V_OUTB, p["out_b"], OUT), (V_VNEMB, p["vn_emb"], HIDDEN),
        (V_MB1, p["mlp_b1"], HIDDEN), (V_MB2, p["mlp_b2"], OUT),
    ]
    for r, v, width in vec_rows:
        slab = slab.at[R_VEC + r, :width].set(v[0])
    return slab


def make_graph(key, n_nodes, n_edges):
    """Random edge_index -> dense adjacency mask adj[dst, src] with self-loops."""
    k1, k2 = jax.random.split(key)
    src = jax.random.randint(k1, (n_edges,), 0, n_nodes)
    dst = jax.random.randint(k2, (n_edges,), 0, n_nodes)
    adj = jnp.zeros((n_nodes, n_nodes), jnp.float32)
    adj = adj.at[dst, src].set(1.0)
    adj = adj.at[jnp.arange(n_nodes), jnp.arange(n_nodes)].set(1.0)  # self loops
    return adj


def gnn_vn_reference(x, adj, p):
    """Pure-JAX reference mirroring the PyTorch forward (batch=None path)."""
    def gat(h_in, w, a_s, a_d, b):
        h = h_in @ w
        e_s = jnp.sum(h * a_s, axis=-1, keepdims=True)
        e_d = jnp.sum(h * a_d, axis=-1, keepdims=True)
        logits = e_d + e_s.T
        logits = jnp.where(logits > 0, logits, GAT_NEG_SLOPE * logits)
        masked = jnp.where(adj > 0, logits, NEG_INF)
        m = jnp.max(masked, axis=-1, keepdims=True)
        pe = jnp.where(adj > 0, jnp.exp(masked - m), 0.0)
        alpha = pe / jnp.maximum(jnp.sum(pe, axis=-1, keepdims=True), 1e-20)
        return alpha @ h + b

    out1 = gat(x, p["w1"], p["att_src1"], p["att_dst1"], p["b1"])
    out2 = gat(out1, p["w2"], p["att_src2"], p["att_dst2"], p["b2"])
    out2 = jnp.where(out2 > 0, out2, ACT_NEG_SLOPE * out2)
    vn = jnp.sum(out2, axis=0, keepdims=True) + p["vn_emb"]
    vn = jnp.maximum(vn @ p["mlp_w1"] + p["mlp_b1"], 0.0)
    vn = jnp.maximum(vn @ p["mlp_w2"] + p["mlp_b2"], 0.0)
    node = out2 @ p["out_w"] + p["out_b"]
    return node, vn


if __name__ == "__main__":
    key = jax.random.PRNGKey(0)
    kx, kg, kp = jax.random.split(key, 3)

    x = jax.random.normal(kx, (N_NODES, F_IN), jnp.float32)
    adj = make_graph(kg, N_NODES, n_edges=32)
    params = make_params(kp)
    slab = pack_params(params)

    # TODO(synk): for real throughput, add a leading graph-batch grid axis
    # (marked "parallel") and stack many graphs' nodes per (8,128)-aligned tile.
    node_out, vn_out = gnn_final_vn_forward(x, adj, slab)
    jax.block_until_ready((node_out, vn_out))

    assert node_out.shape == (N_NODES, OUT)
    assert vn_out.shape == (1, OUT)
    assert bool(jnp.all(jnp.isfinite(node_out))) and bool(jnp.all(jnp.isfinite(vn_out)))

    ref_node, ref_vn = gnn_vn_reference(x, adj, params)
    assert bool(jnp.allclose(node_out, ref_node, atol=1e-2, rtol=1e-2))
    assert bool(jnp.allclose(vn_out, ref_vn, atol=1e-2, rtol=1e-2))

    print("KERNEL_OK")
</pallas_src>

<mosaic_0001>
module attributes {stable_mosaic.version = 11 : i64} {
  func.func @gnn_vn_kernel(%arg0: memref<16x8xf32, #tpu.memory_space<vmem>>, %arg1: memref<16x16xf32, #tpu.memory_space<vmem>>, %arg2: memref<536x128xf32, #tpu.memory_space<vmem>>, %arg3: memref<24x128xf32, #tpu.memory_space<vmem>>) attributes {dimension_semantics = [], scalar_prefetch = 0 : i64, scratch_operands = 0 : i64, tpu.core_type = #tpu.core_type<tc>} {
    %c0 = arith.constant 0 : index
    %c0_0 = arith.constant 0 : index
    %0 = vector.load %arg0[%c0, %c0_0] : memref<16x8xf32, #tpu.memory_space<vmem>>, vector<16x8xf32>
    %c0_1 = arith.constant 0 : index
    %c0_2 = arith.constant 0 : index
    %1 = vector.load %arg1[%c0_1, %c0_2] : memref<16x16xf32, #tpu.memory_space<vmem>>, vector<16x16xf32>
    %c520 = arith.constant 520 : index
    %c0_3 = arith.constant 0 : index
    %2 = vector.load %arg2[%c520, %c0_3] : memref<536x128xf32, #tpu.memory_space<vmem>>, vector<16x128xf32>
    %c0_4 = arith.constant 0 : index
    %c0_5 = arith.constant 0 : index
    %3 = vector.load %arg2[%c0_4, %c0_5] : memref<536x128xf32, #tpu.memory_space<vmem>>, vector<8x128xf32>
    %cst = arith.constant dense<0.000000e+00> : vector<16x128xf32>
    %4 = tpu.matmul %0, %3, %cst {dimension_numbers = #tpu.dot_dimension_numbers<[1], [0], [0], [1], [0, 0, 1, 1], [], []>} : vector<16x8xf32>, vector<8x128xf32>, vector<16x128xf32> -> vector<16x128xf32>
    %5 = vector.extract_strided_slice %2 {offsets = [0, 0], sizes = [1, 128], strides = [1, 1]} : vector<16x128xf32> to vector<1x128xf32>
    %6 = vector.extract_strided_slice %2 {offsets = [1, 0], sizes = [1, 128], strides = [1, 1]} : vector<16x128xf32> to vector<1x128xf32>
    %7 = vector.extract_strided_slice %2 {offsets = [2, 0], sizes = [1, 128], strides = [1, 1]} : vector<16x128xf32> to vector<1x128xf32>
    %cst_6 = arith.constant dense<0.000000e+00> : vector<16x1xf32>
    %8 = tpu.matmul %4, %6, %cst_6 {dimension_numbers = #tpu.dot_dimension_numbers<[1], [1], [0], [0], [0, 0, 1, 0], [], []>} : vector<16x128xf32>, vector<1x128xf32>, vector<16x1xf32> -> vector<16x1xf32>
    %9 = vector.shape_cast %5 : vector<1x128xf32> to vector<1x128xf32>
    %10 = vector.broadcast %9 : vector<1x128xf32> to vector<16x128xf32>
    %cst_7 = arith.constant dense<0.000000e+00> : vector<16x16xf32>
    %11 = tpu.matmul %10, %4, %cst_7 {dimension_numbers = #tpu.dot_dimension_numbers<[1], [1], [0], [0], [0, 0, 1, 0], [], []>} : vector<16x128xf32>, vector<16x128xf32>, vector<16x16xf32> -> vector<16x16xf32>
    %12 = vector.broadcast %8 : vector<16x1xf32> to vector<16x16xf32>
    %13 = arith.addf %12, %11 : vector<16x16xf32>
    %cst_8 = arith.constant 0.000000e+00 : f32
    %14 = vector.broadcast %cst_8 : f32 to vector<16x16xf32>
    %15 = arith.cmpf ogt, %13, %14 : vector<16x16xf32>
    %cst_9 = arith.constant 2.000000e-01 : f32
    %16 = vector.broadcast %cst_9 : f32 to vector<16x16xf32>
    %17 = arith.mulf %16, %13 : vector<16x16xf32>
    %18 = arith.select %15, %13, %17 : vector<16x16xi1>, vector<16x16xf32>
    %cst_10 = arith.constant 0.000000e+00 : f32
    %19 = vector.broadcast %cst_10 : f32 to vector<16x16xf32>
    %20 = arith.cmpf ogt, %1, %19 : vector<16x16xf32>
    %cst_11 = arith.constant -1.000000e+30 : f32
    %21 = vector.broadcast %cst_11 : f32 to vector<16x16xf32>
    %22 = arith.select %20, %18, %21 : vector<16x16xi1>, vector<16x16xf32>
    %cst_12 = arith.constant dense<0xFF800000> : vector<16xf32>
    %23 = vector.multi_reduction <maximumf>, %22, %cst_12 [1] : vector<16x16xf32> to vector<16xf32>
    %24 = vector.shape_cast %23 : vector<16xf32> to vector<16x1xf32>
    %25 = vector.broadcast %24 : vector<16x1xf32> to vector<16x16xf32>
    %26 = arith.subf %22, %25 : vector<16x16xf32>
    %27 = math.exp %26 : vector<16x16xf32>
    %cst_13 = arith.constant 0.000000e+00 : f32
    %28 = vector.broadcast %cst_13 : f32 to vector<16x16xf32>
    %29 = arith.select %20, %27, %28 : vector<16x16xi1>, vector<16x16xf32>
    %cst_14 = arith.constant dense<0.000000e+00> : vector<16xf32>
    %30 = vector.multi_reduction <add>, %29, %cst_14 [1] : vector<16x16xf32> to vector<16xf32>
    %31 = vector.shape_cast %30 : vector<16xf32> to vector<16x1xf32>
    %cst_15 = arith.constant 9.99999968E-21 : f32
    %32 = vector.broadcast %cst_15 : f32 to vector<16x1xf32>
    %33 = arith.maximumf %31, %32 : vector<16x1xf32>
    %34 = tpu.reciprocal %33 {approx = true} : vector<16x1xf32> -> vector<16x1xf32>
    %35 = vector.broadcast %34 : vector<16x1xf32> to vector<16x16xf32>
    %36 = arith.mulf %29, %35 : vector<16x16xf32>
    %cst_16 = arith.constant dense<0.000000e+00> : vector<16x128xf32>
    %37 = tpu.matmul %36, %4, %cst_16 {dimension_numbers = #tpu.dot_dimension_numbers<[1], [0], [0], [1], [0, 0, 1, 1], [], []>} : vector<16x16xf32>, vector<16x128xf32>, vector<16x128xf32> -> vector<16x128xf32>
    %38 = vector.broadcast %7 : vector<1x128xf32> to vector<16x128xf32>
    %39 = arith.addf %37, %38 : vector<16x128xf32>
    %c8 = arith.constant 8 : index
    %c0_17 = arith.constant 0 : index
    %40 = vector.load %arg2[%c8, %c0_17] : memref<536x128xf32, #tpu.memory_space<vmem>>, vector<128x128xf32>
    %cst_18 = arith.constant dense<0.000000e+00> : vector<16x128xf32>
    %41 = tpu.matmul %39, %40, %cst_18 {dimension_numbers = #tpu.dot_dimension_numbers<[1], [0], [0], [1], [0, 0, 1, 1], [], []>} : vector<16x128xf32>, vector<128x128xf32>, vector<16x128xf32> -> vector<16x128xf32>
    %42 = vector.extract_strided_slice %2 {offsets = [3, 0], sizes = [1, 128], strides = [1, 1]} : vector<16x128xf32> to vector<1x128xf32>
    %43 = vector.extract_strided_slice %2 {offsets = [4, 0], sizes = [1, 128], strides = [1, 1]} : vector<16x128xf32> to vector<1x128xf32>
    %44 = vector.extract_strided_slice %2 {offsets = [5, 0], sizes = [1, 128], strides = [1, 1]} : vector<16x128xf32> to vector<1x128xf32>
    %cst_19 = arith.constant dense<0.000000e+00> : vector<16x1xf32>
    %45 = tpu.matmul %41, %43, %cst_19 {dimension_numbers = #tpu.dot_dimension_numbers<[1], [1], [0], [0], [0, 0, 1, 0], [], []>} : vector<16x128xf32>, vector<1x128xf32>, vector<16x1xf32> -> vector<16x1xf32>
    %46 = vector.shape_cast %42 : vector<1x128xf32> to vector<1x128xf32>
    %47 = vector.broadcast %46 : vector<1x128xf32> to vector<16x128xf32>
    %cst_20 = arith.constant dense<0.000000e+00> : vector<16x16xf32>
    %48 = tpu.matmul %47, %41, %cst_20 {dimension_numbers = #tpu.dot_dimension_numbers<[1], [1], [0], [0], [0, 0, 1, 0], [], []>} : vector<16x128xf32>, vector<16x128xf32>, vector<16x16xf32> -> vector<16x16xf32>
    %49 = vector.broadcast %45 : vector<16x1xf32> to vector<16x16xf32>
    %50 = arith.addf %49, %48 : vector<16x16xf32>
    %cst_21 = arith.constant 0.000000e+00 : f32
    %51 = vector.broadcast %cst_21 : f32 to vector<16x16xf32>
    %52 = arith.cmpf ogt, %50, %51 : vector<16x16xf32>
    %cst_22 = arith.constant 2.000000e-01 : f32
    %53 = vector.broadcast %cst_22 : f32 to vector<16x16xf32>
    %54 = arith.mulf %53, %50 : vector<16x16xf32>
    %55 = arith.select %52, %50, %54 : vector<16x16xi1>, vector<16x16xf32>
    %cst_23 = arith.constant 0.000000e+00 : f32
    %56 = vector.broadcast %cst_23 : f32 to vector<16x16xf32>
    %57 = arith.cmpf ogt, %1, %56 : vector<16x16xf32>
    %cst_24 = arith.constant -1.000000e+30 : f32
    %58 = vector.broadcast %cst_24 : f32 to vector<16x16xf32>
    %59 = arith.select %57, %55, %58 : vector<16x16xi1>, vector<16x16xf32>
    %cst_25 = arith.constant dense<0xFF800000> : vector<16xf32>
    %60 = vector.multi_reduction <maximumf>, %59, %cst_25 [1] : vector<16x16xf32> to vector<16xf32>
    %61 = vector.shape_cast %60 : vector<16xf32> to vector<16x1xf32>
    %62 = vector.broadcast %61 : vector<16x1xf32> to vector<16x16xf32>
    %63 = arith.subf %59, %62 : vector<16x16xf32>
    %64 = math.exp %63 : vector<16x16xf32>
    %cst_26 = arith.constant 0.000000e+00 : f32
    %65 = vector.broadcast %cst_26 : f32 to vector<16x16xf32>
    %66 = arith.select %57, %64, %65 : vector<16x16xi1>, vector<16x16xf32>
    %cst_27 = arith.constant dense<0.000000e+00> : vector<16xf32>
    %67 = vector.multi_reduction <add>, %66, %cst_27 [1] : vector<16x16xf32> to vector<16xf32>
    %68 = vector.shape_cast %67 : vector<16xf32> to vector<16x1xf32>
    %cst_28 = arith.constant 9.99999968E-21 : f32
    %69 = vector.broadcast %cst_28 : f32 to vector<16x1xf32>
    %70 = arith.maximumf %68, %69 : vector<16x1xf32>
    %71 = tpu.reciprocal %70 {approx = true} : vector<16x1xf32> -> vector<16x1xf32>
    %72 = vector.broadcast %71 : vector<16x1xf32> to vector<16x16xf32>
    %73 = arith.mulf %66, %72 : vector<16x16xf32>
    %cst_29 = arith.constant dense<0.000000e+00> : vector<16x128xf32>
    %74 = tpu.matmul %73, %41, %cst_29 {dimension_numbers = #tpu.dot_dimension_numbers<[1], [0], [0], [1], [0, 0, 1, 1], [], []>} : vector<16x16xf32>, vector<16x128xf32>, vector<16x128xf32> -> vector<16x128xf32>
    %75 = vector.broadcast %44 : vector<1x128xf32> to vector<16x128xf32>
    %76 = arith.addf %74, %75 : vector<16x128xf32>
    %cst_30 = arith.constant 0.000000e+00 : f32
    %77 = vector.broadcast %cst_30 : f32 to vector<16x128xf32>
    %78 = arith.cmpf ogt, %76, %77 : vector<16x128xf32>
    %cst_31 = arith.constant 0.00999999977 : f32
    %79 = vector.broadcast %cst_31 : f32 to vector<16x128xf32>
    %80 = arith.mulf %79, %76 : vector<16x128xf32>
    %81 = arith.select %78, %76, %80 : vector<16x128xi1>, vector<16x128xf32>
    %cst_32 = arith.constant dense<0.000000e+00> : vector<128xf32>
    %82 = vector.multi_reduction <add>, %81, %cst_32 [0] : vector<16x128xf32> to vector<128xf32>
    %83 = vector.shape_cast %82 : vector<128xf32> to vector<1x128xf32>
    %84 = vector.extract_strided_slice %2 {offsets = [7, 0], sizes = [1, 128], strides = [1, 1]} : vector<16x128xf32> to vector<1x128xf32>
    %85 = arith.addf %83, %84 : vector<1x128xf32>
    %c264 = arith.constant 264 : index
    %c0_33 = arith.constant 0 : index
    %86 = vector.load %arg2[%c264, %c0_33] : memref<536x128xf32, #tpu.memory_space<vmem>>, vector<128x128xf32>
    %c392 = arith.constant 392 : index
    %c0_34 = arith.constant 0 : index
    %87 = vector.load %arg2[%c392, %c0_34] : memref<536x128xf32, #tpu.memory_space<vmem>>, vector<128x128xf32>
    %cst_35 = arith.constant dense<0.000000e+00> : vector<1x128xf32>
    %88 = tpu.matmul %85, %86, %cst_35 {dimension_numbers = #tpu.dot_dimension_numbers<[1], [0], [0], [1], [0, 0, 1, 1], [], []>} : vector<1x128xf32>, vector<128x128xf32>, vector<1x128xf32> -> vector<1x128xf32>
    %89 = vector.extract_strided_slice %2 {offsets = [8, 0], sizes = [1, 128], strides = [1, 1]} : vector<16x128xf32> to vector<1x128xf32>
    %90 = arith.addf %88, %89 : vector<1x128xf32>
    %cst_36 = arith.constant 0.000000e+00 : f32
    %91 = vector.broadcast %cst_36 : f32 to vector<1x128xf32>
    %92 = arith.maximumf %90, %91 : vector<1x128xf32>
    %cst_37 = arith.constant dense<0.000000e+00> : vector<1x128xf32>
    %93 = tpu.matmul %92, %87, %cst_37 {dimension_numbers = #tpu.dot_dimension_numbers<[1], [0], [0], [1], [0, 0, 1, 1], [], []>} : vector<1x128xf32>, vector<128x128xf32>, vector<1x128xf32> -> vector<1x128xf32>
    %94 = vector.extract_strided_slice %2 {offsets = [9, 0], sizes = [1, 128], strides = [1, 1]} : vector<16x128xf32> to vector<1x128xf32>
    %95 = arith.addf %93, %94 : vector<1x128xf32>
    %cst_38 = arith.constant 0.000000e+00 : f32
    %96 = vector.broadcast %cst_38 : f32 to vector<1x128xf32>
    %97 = arith.maximumf %95, %96 : vector<1x128xf32>
    %c136 = arith.constant 136 : index
    %c0_39 = arith.constant 0 : index
    %98 = vector.load %arg2[%c136, %c0_39] : memref<536x128xf32, #tpu.memory_space<vmem>>, vector<128x128xf32>
    %cst_40 = arith.constant dense<0.000000e+00> : vector<16x128xf32>
    %99 = tpu.matmul %81, %98, %cst_40 {dimension_numbers = #tpu.dot_dimension_numbers<[1], [0], [0], [1], [0, 0, 1, 1], [], []>} : vector<16x128xf32>, vector<128x128xf32>, vector<16x128xf32> -> vector<16x128xf32>
    %100 = vector.extract_strided_slice %2 {offsets = [6, 0], sizes = [1, 128], strides = [1, 1]} : vector<16x128xf32> to vector<1x128xf32>
    %101 = vector.broadcast %100 : vector<1x128xf32> to vector<16x128xf32>
    %102 = arith.addf %99, %101 : vector<16x128xf32>
    %c0_41 = arith.constant 0 : index
    %c0_42 = arith.constant 0 : index
    %103 = vector.load %arg3[%c0_41, %c0_42] : memref<24x128xf32, #tpu.memory_space<vmem>>, vector<16x128xf32>
    tpu.vector_store %arg3[%c0_41, %c0_42], %102 {strides = array<i32>} : memref<24x128xf32, #tpu.memory_space<vmem>>, vector<16x128xf32>,
    %104 = vector.shape_cast %97 : vector<1x128xf32> to vector<1x128xf32>
    %105 = vector.broadcast %104 : vector<1x128xf32> to vector<8x128xf32>
    %c16 = arith.constant 16 : index
    %c0_43 = arith.constant 0 : index
    %106 = vector.load %arg3[%c16, %c0_43] : memref<24x128xf32, #tpu.memory_space<vmem>>, vector<8x128xf32>
    tpu.vector_store %arg3[%c16, %c0_43], %105 {strides = array<i32>} : memref<24x128xf32, #tpu.memory_space<vmem>>, vector<8x128xf32>,
    return
  }
}

</mosaic_0001>

<bundles_post_ra>
// kernel: gnn_final_vn_forward.1
= control target key start
LH: loop header
LB: loop body
LE: loop exit
PB: predicated region body
PF: predicated region fallthrough
CT: control target
= control target key end

     0   :  { %8 = vsyncpa [#allocation3], 0  ;;  %s1243_s12 = smov [#allocation2]   ;;  %s1387_s0 = inlined_call_operand.vmem [shape: f32[16,8], index: 0, kind: input, shape index: {}]   ;;  %s1388_s1 = inlined_call_operand.vmem [shape: f32[16,16], index: 1, kind: input, shape index: {}]   ;;  %s1389_s2 = inlined_call_operand.hbm [shape: f32[536,128], index: 2, kind: input, shape index: {}]   ;;  %s1390_s3 = inlined_call_operand.vmem [shape: f32[24,128], index: 3, kind: output, shape index: {}]  }
   0x1   :  { %s18_s13 = sshll.u32 %s1243_s12, 4  ;;  %s19_s13 = int_to_ptr.vmem [resolvable:$true] %s18_s13 }
   0x2   :  { %s1229_s14 = scalar_lea.vmem %s19_s13, 8576  ;;  %p1234_p1 = scmp.lt.s32.totalorder %s19_s13, %s19_s13 }
   0x3   :  { %p1230_p0 = scmp.ne.s32.totalorder %s19_s13, %s1229_s14  ;;  %p1235_p2 = scmp.lt.s32.totalorder %s1229_s14, %s1229_s14 }
   0x5   :  { %p1236_p3 = por %p1235_p2, %p1234_p1 }
   0x7   :  { %p1237_p4 = pnand %p1236_p3, %p1230_p0 }
   0x9   :  { %1240 = shalt.err (!%p1237_p4)
}
   0xa   :  { %s1244_s15 = smov 128   ;;  %s1245_s16 = smov 8  }
   0xb   :  { %24 = dma.hbm_to_vmem [thread:$0]  %s1389_s2, 8576, %s19_s13, [#allocation3], %s1244_s15, %s1244_s15, %s1245_s16  }
   0xc   :  { %1241 = dma.done.wait [#allocation3], 8576  }
   0xd   :  { %1242 = vsyncadd [#allocation3], 4294958720  ;;  %vm35_vm0 = vcmask 64512   ;;  %v34_v0 = vld [vmem:[#allocation2] sm:$0xff]  ;;  %v29_v2 = vld [vmem:[%s1387_s0 + $0x8] sm:$0xff]  ;;  %v117_v3 = vlaneseq  ;;  %vm218_vm5 = vcmask 130048  }
   0xe   :  { %v28_v1 = vld [vmem:[%s1387_s0] sm:$0xff]  ;;  %1027 = vmatprep.subr.mxu0 %v34_v0  ;;  %v1280_v6 = vld [vmem:[#allocation2 + $0x208] sm:$0xff]  ;;  %v344_v51 = vld [vmem:[#allocation2 + $0x78] sm:$0xff]  ;;  %vm1247_vm8 = vmmov 0  }
   0xf   :  { %1029 = vmatprep.mubr.msk.f32.mxu0 %vm35_vm0, %v28_v1  ;;  %1028 = vmatpush3.msra.mxu0 %v34_v0  ;;  %v1277_v4 = vshrl.u32 %v117_v3, 7  ;;  %v1290_v19 = vld [vmem:[%s1388_s1] sm:$0xff]  ;;  %v1295_v22 = vld [vmem:[%s1388_s1 + $0x8] sm:$0xff]  ;;  %v343_v52 = vld [vmem:[#allocation2 + $0x70] sm:$0xff] }
  0x10   :  { %1030 = vmatmul.mubr.msk.f32.vlgmr.msra.gmra.mxu0 %vm35_vm0, %v29_v2  ;;  %vm214_vm3 = vcmp.gt.f32.partialorder %v1290_v19, 0.0  ;;  %vm215_vm4 = vcmp.gt.f32.partialorder %v1295_v22, 0.0  ;;  %v345_v42 = vld [vmem:[#allocation2 + $0x80] sm:$0xff]  ;;  %v342_v53 = vld [vmem:[#allocation2 + $0x68] sm:$0xff]  ;;  %v340_v55 = vld [vmem:[#allocation2 + $0x58] sm:$0xff] }
  0x11   :  { %v129_v5 = vsub.s32 0, %v1277_v4  ;;  %v119_v8 = vsub.s32 1, %v1277_v4  ;;  %v341_v54 = vld [vmem:[#allocation2 + $0x60] sm:$0xff]  ;;  %v339_v56 = vld [vmem:[#allocation2 + $0x50] sm:$0xff]  ;;  %v338_v57 = vld [vmem:[#allocation2 + $0x48] sm:$0xff]  ;;  %v247_v2 = vsub.s32 2, %v1277_v4 }
  0x12   :  { %v337_v58 = vld [vmem:[#allocation2 + $0x40] sm:$0xff]  ;;  %v336_v59 = vld [vmem:[#allocation2 + $0x38] sm:$0xff]  ;;  %v335_v60 = vld [vmem:[#allocation2 + $0x30] sm:$0xff] }
  0x13   :  { %v130_v7 = vrot.slane %v1280_v6, %v129_v5  ;;  %v120_v10 = vrot.slane %v1280_v6, %v119_v8  ;;  %v334_v61 = vld [vmem:[#allocation2 + $0x28] sm:$0xff]  ;;  %v333_v62 = vld [vmem:[#allocation2 + $0x20] sm:$0xff]  ;;  %v332_v63 = vld [vmem:[#allocation2 + $0x18] sm:$0xff]  ;;  %v248_v3 = vrot.slane %v1280_v6, %v247_v2 }
  0x14   :  { %v331_v0 = vld [vmem:[#allocation2 + $0x10] sm:$0xff]  ;;  %v330_v1 = vld [vmem:[#allocation2 + $0x8] sm:$0xff]  ;;  %v660_v19 = vld [vmem:[#allocation2 + $0x180] sm:$0xff] }
  0x15   :  { %1036 = vmatprep.mubr.f32.mxu0 %v130_v7  ;;  %v648_v2 = vld [vmem:[#allocation2 + $0x120] sm:$0xff] }
  0xd0   :  { %v1031_v9 = vpop.f32.mrf.mxu0 }
  0xd1   :  { %1032 = vmatprep.subr.mxu0 %v1031_v9  ;;  %v122_v13 = vmul.f32 %v1031_v9, %v120_v10 }
  0xd2   :  { %v108_v11 = vpop.f32.mrf.mxu0  ;;  %1033 = vmatpush3.xpose.msra.mxu0 %v1031_v9 }
  0xd3   :  { %1034 = vmatprep.subr.mxu0 %v108_v11  ;;  %v121_v12 = vmul.f32 %v120_v10, %v108_v11 }
  0xd5   :  { %123 = vadd.xlane.f32.xlu0 %v121_v12 }
  0xd6   :  { %1035 = vmatpush3.xpose.msra.mxu0 %v108_v11 }
  0xd7   :  { %1039 = vmatprep.subr.mxu0 %v1031_v9 }
  0xd9   :  { %1037 = vmatmul.mubr.f32.vlgmr.msra.gmra.mxu0 %v130_v7  ;;  %125 = vadd.xlane.f32.xlu0 %v122_v13  ;;  %v423_v13 = vsub.s32 4, %v1277_v4 }
  0xda   :  { %1040 = vmatpush3.msra.mxu0 %v1031_v9 }
  0xdb   :  { %1041 = vmatprep.subr.mxu0 %v108_v11 }
  0xdc   :  { %1042 = vmatpush3.msra.mxu0 %v108_v11  ;;  %v433_v11 = vsub.s32 3, %v1277_v4 }
  0xdd   :  { %1046 = vmatprep.subr.mxu0 %v345_v42 }
  0xde   :  { %v434_v12 = vrot.slane %v1280_v6, %v433_v11  ;;  %v675_v11 = vld [vmem:[#allocation2 + $0x1f8] sm:$0xff] }
  0xe0   :  { %1085 = vmatprep.mubr.f32.mxu1 %v434_v12 }
 0x15e   :  { %v124_v14 = vpop.xlane.xlu0 %123 }
 0x162   :  { %v126_v15 = vpop.xlane.xlu0 %125 }
 0x199   :  { %v1038_v16 = vpop.f32.mrf.mxu0 }
 0x19a   :  { %v207_v17 = vadd.f32 %v1038_v16, %v126_v15 }
 0x19b   :  { %v197_v18 = vpop.f32.mrf.mxu0 }
 0x19c   :  { %v211_v20 = vmul.f32 0.2, %v207_v17  ;;  %v206_v21 = vadd.f32 %v197_v18, %v124_v14  ;;  %vm209_vm1 = vcmp.gt.f32.partialorder %v207_v17, 0.0  ;;  %v424_v14 = vrot.slane %v1280_v6, %v423_v13  ;;  %v673_v13 = vld [vmem:[#allocation2 + $0x1e8] sm:$0xff] }
 0x19e   :  { %v210_v23 = vmul.f32 0.2, %v206_v21  ;;  %vm208_vm2 = vcmp.gt.f32.partialorder %v206_v21, 0.0  ;;  %v213_v25 = vsel %vm209_vm1, %v207_v17, %v211_v20 }
 0x19f   :  { %v217_v28 = vsel %vm215_vm4, %v213_v25, -1e+30 }
 0x1a0   :  { %v212_v24 = vsel %vm208_vm2, %v206_v21, %v210_v23  ;;  %v222_v29 = vsel %vm218_vm5, %v217_v28, -inf }
 0x1a1   :  { %v216_v26 = vsel %vm214_vm3, %v212_v24, -1e+30 }
 0x1a2   :  { %v219_v27 = vsel %vm218_vm5, %v216_v26, -inf }
 0x1a3   :  { %220 = vmax.xlane.f32.xlu1 %v219_v27 }
 0x1a7   :  { %223 = vmax.xlane.f32.xlu1 %v222_v29 }
 0x22c   :  { %v221_v30 = vpop.xlane.xlu1 %220 }
 0x22d   :  { %v225_v31 = vsub.f32 %v216_v26, %v221_v30 }
 0x22f   :  { %v227_v32 = vmul.f32 1.442695, %v225_v31 }
 0x230   :  { %v224_v33 = vpop.xlane.xlu1 %223 }
 0x231   :  { %1205 = vpow2.f32 %v227_v32  ;;  %v226_v34 = vsub.f32 %v217_v28, %v224_v33 }
 0x233   :  { %v229_v35 = vmul.f32 1.442695, %v226_v34 }
 0x235   :  { %1207 = vpow2.f32 %v229_v35 }
 0x23e   :  { %v1206_v36 = vpop.eup %1205 }
 0x23f   :  { %v231_v37 = vsel %vm214_vm3, %v1206_v36, 0.0 }
 0x240   :  { %v233_v38 = vsel %vm218_vm5, %v231_v37, 0.0 }
 0x241   :  { %234 = vadd.xlane.f32.xlu0 %v233_v38 }
 0x242   :  { %v1208_v39 = vpop.eup %1207 }
 0x243   :  { %v232_v40 = vsel %vm215_vm4, %v1208_v39, 0.0 }
 0x244   :  { %v236_v41 = vsel %vm218_vm5, %v232_v40, 0.0 }
 0x245   :  { %237 = vadd.xlane.f32.xlu1 %v236_v41 }
 0x2ca   :  { %v235_v43 = vpop.xlane.xlu0 %234 }
 0x2cb   :  { %v239_v44 = vmax.f32 %v235_v43, 1e-20 }
 0x2cd   :  { %1209 = vrcp.f32 %v239_v44 }
 0x2ce   :  { %v238_v45 = vpop.xlane.xlu1 %237 }
 0x2cf   :  { %v240_v46 = vmax.f32 %v238_v45, 1e-20 }
 0x2d1   :  { %1211 = vrcp.f32 %v240_v46 }
 0x2da   :  { %v1210_v47 = vpop.eup %1209 }
 0x2db   :  { %v243_v48 = vmul.f32 %v1210_v47, %v231_v37  ;;  %v1246_v47 = vmov 0.0  }
 0x2dd   :  { %1043 = vmatprep.mubr.msk.f32.mxu0 %vm218_vm5, %v243_v48 }
 0x2de   :  { %v1212_v49 = vpop.eup %1211 }
 0x2df   :  { %v244_v50 = vmul.f32 %v1212_v49, %v232_v40 }
 0x2e1   :  { %1044 = vmatmul.mubr.msk.f32.vlgmr.msra.gmra.mxu0 %vm218_vm5, %v244_v50 }
 0x2e2   :  { %1047 = vmatpush3.msra.mxu0 %v345_v42 }
 0x2e3   :  { %1048 = vmatprep.subr.mxu0 %v344_v51 }
 0x2e4   :  { %1049 = vmatpush3.msra.mxu0 %v344_v51 }
 0x2e5   :  { %1050 = vmatprep.subr.mxu0 %v343_v52 }
 0x2e6   :  { %1051 = vmatpush3.msra.mxu0 %v343_v52 }
 0x2e7   :  { %1052 = vmatprep.subr.mxu0 %v342_v53 }
 0x2e8   :  { %1053 = vmatpush3.msra.mxu0 %v342_v53 }
 0x2e9   :  { %1054 = vmatprep.subr.mxu0 %v341_v54 }
 0x2ea   :  { %1055 = vmatpush3.msra.mxu0 %v341_v54 }
 0x2eb   :  { %1056 = vmatprep.subr.mxu0 %v340_v55 }
 0x2ec   :  { %1057 = vmatpush3.msra.mxu0 %v340_v55  ;;  %v659_v55 = vld [vmem:[#allocation2 + $0x178] sm:$0xff] }
 0x2ed   :  { %1058 = vmatprep.subr.mxu0 %v339_v56 }
 0x2ee   :  { %1059 = vmatpush3.msra.mxu0 %v339_v56  ;;  %v658_v56 = vld [vmem:[#allocation2 + $0x170] sm:$0xff] }
 0x2ef   :  { %1060 = vmatprep.subr.mxu0 %v338_v57 }
 0x2f0   :  { %1061 = vmatpush3.msra.mxu0 %v338_v57  ;;  %v657_v57 = vld [vmem:[#allocation2 + $0x168] sm:$0xff] }
 0x2f1   :  { %1062 = vmatprep.subr.mxu0 %v337_v58 }
 0x2f2   :  { %1063 = vmatpush3.msra.mxu0 %v337_v58  ;;  %v656_v58 = vld [vmem:[#allocation2 + $0x160] sm:$0xff] }
 0x2f3   :  { %1064 = vmatprep.subr.mxu0 %v336_v59 }
 0x2f4   :  { %1065 = vmatpush3.msra.mxu0 %v336_v59  ;;  %v655_v59 = vld [vmem:[#allocation2 + $0x158] sm:$0xff] }
 0x2f5   :  { %1066 = vmatprep.subr.mxu0 %v335_v60 }
 0x2f6   :  { %1067 = vmatpush3.msra.mxu0 %v335_v60  ;;  %v654_v60 = vld [vmem:[#allocation2 + $0x150] sm:$0xff] }
 0x2f7   :  { %1068 = vmatprep.subr.mxu0 %v334_v61 }
 0x2f8   :  { %1069 = vmatpush3.msra.mxu0 %v334_v61  ;;  %v653_v61 = vld [vmem:[#allocation2 + $0x148] sm:$0xff] }
 0x2f9   :  { %1070 = vmatprep.subr.mxu0 %v333_v62 }
 0x2fa   :  { %1071 = vmatpush3.msra.mxu0 %v333_v62  ;;  %v652_v62 = vld [vmem:[#allocation2 + $0x140] sm:$0xff] }
 0x2fb   :  { %1072 = vmatprep.subr.mxu0 %v332_v63 }
 0x2fc   :  { %1073 = vmatpush3.msra.mxu0 %v332_v63  ;;  %v651_v63 = vld [vmem:[#allocation2 + $0x138] sm:$0xff] }
 0x2fd   :  { %1074 = vmatprep.subr.mxu0 %v331_v0 }
 0x2fe   :  { %1075 = vmatpush3.msra.mxu0 %v331_v0  ;;  %v650_v0 = vld [vmem:[#allocation2 + $0x130] sm:$0xff] }
 0x2ff   :  { %1076 = vmatprep.subr.mxu0 %v330_v1 }
 0x300   :  { %1077 = vmatpush3.msra.mxu0 %v330_v1  ;;  %v649_v1 = vld [vmem:[#allocation2 + $0x128] sm:$0xff] }
 0x301   :  { %1130 = vmatprep.subr.mxu0 %v1246_v47 }
 0x3a1   :  { %v1045_v7 = vpop.f32.mrf.mxu0 }
 0x3a2   :  { %v327_v10 = vadd.f32 %v1045_v7, %v248_v3  ;;  %v646_v7 = vld [vmem:[#allocation2 + $0x110] sm:$0xff] }
 0x3a3   :  { %v321_v8 = vpop.f32.mrf.mxu0 }
 0x3a4   :  { %v322_v9 = vadd.f32 %v321_v8, %v248_v3  ;;  %v647_v3 = vld [vmem:[#allocation2 + $0x118] sm:$0xff]  ;;  %v645_v8 = vld [vmem:[#allocation2 + $0x108] sm:$0xff] }
 0x3a6   :  { %1078 = vmatprep.mubr.f32.mxu0 %v322_v9  ;;  %v1351_v9 = vld [vmem:[#allocation2 + $0x100] sm:$0xff] }
 0x3a7   :  { %1079 = vmatmul.mubr.f32.vlgmr.msra.gmra.mxu0 %v327_v10  ;;  %v676_v10 = vld [vmem:[#allocation2 + $0x200] sm:$0xff] }
 0x3a8   :  { %1162 = vmatprep.mubr.msk.f32.mxu0 %vm1247_vm8, %v1246_v47  ;;  %1131 = vmatpush3.msra.mxu0 %v676_v10 }
 0x3a9   :  { %1132 = vmatprep.subr.mxu0 %v1246_v47 }
 0x3aa   :  { %1133 = vmatpush3.msra.mxu0 %v675_v11 }
 0x3ab   :  { %1134 = vmatprep.subr.mxu0 %v1246_v47 }
 0x467   :  { %v1080_v15 = vpop.f32.mrf.mxu0 }
 0x468   :  { %1081 = vmatprep.subr.mxu1 %v1080_v15  ;;  %v426_v16 = vmul.f32 %v1080_v15, %v424_v14 }
 0x469   :  { %v412_v17 = vpop.f32.mrf.mxu0  ;;  %1082 = vmatpush3.xpose.msra.mxu1 %v1080_v15 }
 0x46a   :  { %429 = vadd.xlane.f32.xlu1 %v426_v16  ;;  %1083 = vmatprep.subr.mxu1 %v412_v17  ;;  %v425_v18 = vmul.f32 %v424_v14, %v412_v17  ;;  %v672_v14 = vld [vmem:[#allocation2 + $0x1e0] sm:$0xff]  ;;  %v670_v16 = vld [vmem:[#allocation2 + $0x1d0] sm:$0xff] }
 0x46c   :  { %427 = vadd.xlane.f32.xlu0 %v425_v18  ;;  %v668_v18 = vld [vmem:[#allocation2 + $0x1c0] sm:$0xff] }
 0x46d   :  { %1084 = vmatpush3.xpose.msra.mxu1 %v412_v17 }
 0x46e   :  { %1088 = vmatprep.subr.mxu1 %v1080_v15 }
 0x470   :  { %1086 = vmatmul.mubr.f32.vlgmr.msra.gmra.mxu1 %v434_v12  ;;  %v674_v12 = vld [vmem:[#allocation2 + $0x1f0] sm:$0xff] }
 0x471   :  { %1089 = vmatpush3.msra.mxu1 %v1080_v15  ;;  %1135 = vmatpush3.msra.mxu0 %v674_v12  ;;  %v671_v15 = vld [vmem:[#allocation2 + $0x1d8] sm:$0xff] }
 0x472   :  { %1090 = vmatprep.subr.mxu1 %v412_v17  ;;  %1136 = vmatprep.subr.mxu0 %v1246_v47 }
 0x473   :  { %1091 = vmatpush3.msra.mxu1 %v412_v17  ;;  %1137 = vmatpush3.msra.mxu0 %v673_v13  ;;  %v669_v17 = vld [vmem:[#allocation2 + $0x1c8] sm:$0xff] }
 0x474   :  { %1095 = vmatprep.subr.mxu1 %v1246_v47  ;;  %1138 = vmatprep.subr.mxu0 %v1246_v47 }
 0x475   :  { %1139 = vmatpush3.msra.mxu0 %v672_v14 }
 0x476   :  { %1140 = vmatprep.subr.mxu0 %v1246_v47 }
 0x477   :  { %1141 = vmatpush3.msra.mxu0 %v671_v15 }
 0x478   :  { %1142 = vmatprep.subr.mxu0 %v1246_v47 }
 0x479   :  { %1143 = vmatpush3.msra.mxu0 %v670_v16 }
 0x47a   :  { %1144 = vmatprep.subr.mxu0 %v1246_v47 }
 0x47b   :  { %1145 = vmatpush3.msra.mxu0 %v669_v17 }
 0x47c   :  { %1146 = vmatprep.subr.mxu0 %v1246_v47 }
 0x47d   :  { %1147 = vmatpush3.msra.mxu0 %v668_v18 }
 0x47e   :  { %1148 = vmatprep.subr.mxu0 %v1246_v47 }
 0x4f3   :  { %v430_v20 = vpop.xlane.xlu1 %429 }
 0x4f5   :  { %v428_v24 = vpop.xlane.xlu0 %427 }
 0x530   :  { %v1087_v21 = vpop.f32.mrf.mxu1 }
 0x531   :  { %v511_v23 = vadd.f32 %v1087_v21, %v430_v20  ;;  %v667_v20 = vld [vmem:[#allocation2 + $0x1b8] sm:$0xff]  ;;  %v666_v21 = vld [vmem:[#allocation2 + $0x1b0] sm:$0xff] }
 0x532   :  { %v501_v25 = vpop.f32.mrf.mxu1  ;;  %1149 = vmatpush3.msra.mxu0 %v667_v20 }
 0x533   :  { %v515_v26 = vmul.f32 0.2, %v511_v23  ;;  %v510_v27 = vadd.f32 %v501_v25, %v428_v24  ;;  %vm513_vm6 = vcmp.gt.f32.partialorder %v511_v23, 0.0  ;;  %1150 = vmatprep.subr.mxu0 %v1246_v47  ;;  %v664_v24 = vld [vmem:[#allocation2 + $0x1a0] sm:$0xff]  ;;  %v548_v25 = vsub.s32 5, %v1277_v4 }
 0x534   :  { %1151 = vmatpush3.msra.mxu0 %v666_v21 }
 0x535   :  { %v514_v28 = vmul.f32 0.2, %v510_v27  ;;  %v517_v29 = vsel %vm513_vm6, %v511_v23, %v515_v26  ;;  %vm512_vm7 = vcmp.gt.f32.partialorder %v510_v27, 0.0  ;;  %v665_v23 = vld [vmem:[#allocation2 + $0x1a8] sm:$0xff]  ;;  %1152 = vmatprep.subr.mxu0 %v1246_v47  ;;  %v549_v26 = vrot.slane %v1280_v6, %v548_v25 }
 0x536   :  { %v519_v30 = vsel %vm215_vm4, %v517_v29, -1e+30  ;;  %1153 = vmatpush3.msra.mxu0 %v665_v23 }
 0x537   :  { %v523_v31 = vsel %vm218_vm5, %v519_v30, -inf  ;;  %v516_v32 = vsel %vm512_vm7, %v510_v27, %v514_v28  ;;  %1154 = vmatprep.subr.mxu0 %v1246_v47 }
 0x538   :  { %524 = vmax.xlane.f32.xlu1 %v523_v31  ;;  %v518_v33 = vsel %vm214_vm3, %v516_v32, -1e+30  ;;  %1155 = vmatpush3.msra.mxu0 %v664_v24 }
 0x539   :  { %v520_v34 = vsel %vm218_vm5, %v518_v33, -inf  ;;  %1156 = vmatprep.subr.mxu0 %v1246_v47 }
 0x53a   :  { %521 = vmax.xlane.f32.xlu0 %v520_v34 }
 0x5c1   :  { %v525_v35 = vpop.xlane.xlu1 %524 }
 0x5c2   :  { %v527_v36 = vsub.f32 %v519_v30, %v525_v35 }
 0x5c3   :  { %v522_v37 = vpop.xlane.xlu0 %521 }
 0x5c4   :  { %v530_v38 = vmul.f32 1.442695, %v527_v36  ;;  %v526_v39 = vsub.f32 %v518_v33, %v522_v37 }
 0x5c6   :  { %1213 = vpow2.f32 %v530_v38  ;;  %v528_v40 = vmul.f32 1.442695, %v526_v39 }
 0x5c8   :  { %1215 = vpow2.f32 %v528_v40 }
 0x5d3   :  { %v1214_v41 = vpop.eup %1213 }
 0x5d4   :  { %v533_v42 = vsel %vm215_vm4, %v1214_v41, 0.0 }
 0x5d5   :  { %v1216_v43 = vpop.eup %1215  ;;  %v537_v44 = vsel %vm218_vm5, %v533_v42, 0.0 }
 0x5d6   :  { %538 = vadd.xlane.f32.xlu1 %v537_v44  ;;  %v532_v45 = vsel %vm214_vm3, %v1216_v43, 0.0  ;;  %v839_v44 = vld [vmem:[#allocation2 + $0xf8] sm:$0xff] }
 0x5d7   :  { %v534_v46 = vsel %vm218_vm5, %v532_v45, 0.0 }
 0x5d8   :  { %535 = vadd.xlane.f32.xlu0 %v534_v46  ;;  %v837_v46 = vld [vmem:[#allocation2 + $0xe8] sm:$0xff] }
 0x65f   :  { %v539_v48 = vpop.xlane.xlu1 %538 }
 0x660   :  { %v541_v49 = vmax.f32 %v539_v48, 1e-20  ;;  %v836_v48 = vld [vmem:[#allocation2 + $0xe0] sm:$0xff] }
 0x661   :  { %v536_v50 = vpop.xlane.xlu0 %535 }
 0x662   :  { %v540_v22 = vmax.f32 %v536_v50, 1e-20  ;;  %1217 = vrcp.f32 %v541_v49  ;;  %v835_v49 = vld [vmem:[#allocation2 + $0xd8] sm:$0xff]  ;;  %v834_v50 = vld [vmem:[#allocation2 + $0xd0] sm:$0xff] }
 0x664   :  { %1219 = vrcp.f32 %v540_v22  ;;  %v833_v22 = vld [vmem:[#allocation2 + $0xc8] sm:$0xff] }
 0x66f   :  { %v1218_v51 = vpop.eup %1217 }
 0x670   :  { %v545_v54 = vmul.f32 %v1218_v51, %v533_v42  ;;  %v832_v51 = vld [vmem:[#allocation2 + $0xc0] sm:$0xff] }
 0x671   :  { %v1220_v52 = vpop.eup %1219 }
 0x672   :  { %v544_v53 = vmul.f32 %v1220_v52, %v532_v45  ;;  %v838_v45 = vld [vmem:[#allocation2 + $0xf0] sm:$0xff]  ;;  %v831_v52 = vld [vmem:[#allocation2 + $0xb8] sm:$0xff] }
 0x674   :  { %1092 = vmatprep.mubr.msk.f32.mxu1 %vm218_vm5, %v544_v53  ;;  %v830_v53 = vld [vmem:[#allocation2 + $0xb0] sm:$0xff] }
 0x675   :  { %1093 = vmatmul.mubr.msk.f32.vlgmr.msra.gmra.mxu1 %vm218_vm5, %v545_v54  ;;  %v829_v54 = vld [vmem:[#allocation2 + $0xa8] sm:$0xff] }
 0x676   :  { %1096 = vmatpush3.msra.mxu1 %v660_v19  ;;  %1127 = vmatprep.mubr.msk.f32.mxu1 %vm1247_vm8, %v1246_v47  ;;  %v828_v19 = vld [vmem:[#allocation2 + $0xa0] sm:$0xff] }
 0x677   :  { %1097 = vmatprep.subr.mxu1 %v1246_v47 }
 0x678   :  { %1098 = vmatpush3.msra.mxu1 %v659_v55  ;;  %v827_v55 = vld [vmem:[#allocation2 + $0x98] sm:$0xff] }
 0x679   :  { %1099 = vmatprep.subr.mxu1 %v1246_v47 }
 0x67a   :  { %1100 = vmatpush3.msra.mxu1 %v658_v56  ;;  %v826_v56 = vld [vmem:[#allocation2 + $0x90] sm:$0xff] }
 0x67b   :  { %1101 = vmatprep.subr.mxu1 %v1246_v47 }
 0x67c   :  { %1102 = vmatpush3.msra.mxu1 %v657_v57  ;;  %v825_v57 = vld [vmem:[#allocation2 + $0x88] sm:$0xff] }
 0x67d   :  { %1103 = vmatprep.subr.mxu1 %v1246_v47 }
 0x67e   :  { %1104 = vmatpush3.msra.mxu1 %v656_v58  ;;  %v663_v58 = vld [vmem:[#allocation2 + $0x198] sm:$0xff] }
 0x67f   :  { %1105 = vmatprep.subr.mxu1 %v1246_v47  ;;  %1157 = vmatpush3.msra.mxu0 %v663_v58 }
 0x680   :  { %1106 = vmatpush3.msra.mxu1 %v655_v59  ;;  %1158 = vmatprep.subr.mxu0 %v1246_v47  ;;  %v662_v59 = vld [vmem:[#allocation2 + $0x190] sm:$0xff] }
 0x681   :  { %1107 = vmatprep.subr.mxu1 %v1246_v47  ;;  %1159 = vmatpush3.msra.mxu0 %v662_v59 }
 0x682   :  { %1108 = vmatpush3.msra.mxu1 %v654_v60  ;;  %v661_v60 = vld [vmem:[#allocation2 + $0x188] sm:$0xff]  ;;  %1160 = vmatprep.subr.mxu0 %v1246_v47 }
 0x683   :  { %1109 = vmatprep.subr.mxu1 %v1246_v47  ;;  %1161 = vmatpush3.msra.mxu0 %v661_v60 }
 0x684   :  { %1110 = vmatpush3.msra.mxu1 %v653_v61  ;;  %v33_v61 = vld [vmem:[#allocation2 + $0x210] sm:$0xff] }
 0x685   :  { %1111 = vmatprep.subr.mxu1 %v1246_v47 }
 0x686   :  { %1112 = vmatpush3.msra.mxu1 %v652_v62 }
 0x687   :  { %1113 = vmatprep.subr.mxu1 %v1246_v47 }
 0x688   :  { %1114 = vmatpush3.msra.mxu1 %v651_v63 }
 0x689   :  { %1115 = vmatprep.subr.mxu1 %v1246_v47 }
 0x68a   :  { %1116 = vmatpush3.msra.mxu1 %v650_v0 }
 0x68b   :  { %1117 = vmatprep.subr.mxu1 %v1246_v47 }
 0x68c   :  { %1118 = vmatpush3.msra.mxu1 %v649_v1 }
 0x68d   :  { %1119 = vmatprep.subr.mxu1 %v1246_v47 }
 0x68e   :  { %1120 = vmatpush3.msra.mxu1 %v648_v2  ;;  %v843_v2 = vsub.s32 6, %v1277_v4 }
 0x68f   :  { %1121 = vmatprep.subr.mxu1 %v1246_v47 }
 0x690   :  { %1122 = vmatpush3.msra.mxu1 %v647_v3  ;;  %v844_v3 = vrot.slane %v1280_v6, %v843_v2 }
 0x691   :  { %1123 = vmatprep.subr.mxu1 %v1246_v47 }
 0x692   :  { %1124 = vmatpush3.msra.mxu1 %v646_v7 }
 0x693   :  { %1125 = vmatprep.subr.mxu1 %v1246_v47  ;;  %v752_v47 = vrot.slane %v33_v61, 1 }
 0x694   :  { %1126 = vmatpush3.msra.mxu1 %v645_v8 }
 0x695   :  { %1165 = vmatprep.subr.mxu1 %v1351_v9 }
 0x735   :  { %v1094_v27 = vpop.f32.mrf.mxu1 }
 0x736   :  { %v628_v28 = vadd.f32 %v1094_v27, %v549_v26 }
 0x737   :  { %v622_v29 = vpop.f32.mrf.mxu1 }
 0x738   :  { %v634_v30 = vmul.f32 0.01, %v628_v28  ;;  %v623_v31 = vadd.f32 %v622_v29, %v549_v26  ;;  %vm632_vm9 = vcmp.gt.f32.partialorder %v628_v28, 0.0 }
 0x73a   :  { %vm631_vm10 = vcmp.gt.f32.partialorder %v623_v31, 0.0  ;;  %v633_v32 = vmul.f32 0.01, %v623_v31  ;;  %v636_v33 = vsel %vm632_vm9, %v628_v28, %v634_v30 }
 0x73c   :  { %v635_v34 = vsel %vm631_vm10, %v623_v31, %v633_v32 }
 0x73d   :  { %v637_v35 = vadd.f32 %v636_v33, %v635_v34 }
 0x73f   :  { %v638_v36 = vrot.slane %v637_v35, 4 }
 0x741   :  { %v639_v37 = vadd.f32 %v638_v36, %v637_v35 }
 0x743   :  { %v640_v38 = vrot.slane %v639_v37, 2 }
 0x745   :  { %v641_v39 = vadd.f32 %v640_v38, %v639_v37 }
 0x747   :  { %v642_v40 = vrot.slane %v641_v39, 1 }
 0x749   :  { %v643_v41 = vadd.f32 %v642_v40, %v641_v39 }
 0x74b   :  { %v644_v42 = vadd.f32 %v643_v41, %v1280_v6 }
 0x74d   :  { %v678_v43 = vrot.slane %v644_v42, 7 }
 0x74f   :  { %1128 = vmatmul.mubr.f32.vlgmr.msra.gmra.mxu1 %v678_v43 }
 0x750   :  { %1166 = vmatpush3.msra.mxu1 %v1351_v9  ;;  %1197 = vmatprep.mubr.f32.mxu1 %v635_v34 }
 0x751   :  { %1167 = vmatprep.subr.mxu1 %v839_v44 }
 0x752   :  { %1168 = vmatpush3.msra.mxu1 %v839_v44 }
 0x753   :  { %1169 = vmatprep.subr.mxu1 %v838_v45 }
 0x754   :  { %1170 = vmatpush3.msra.mxu1 %v838_v45 }
 0x755   :  { %1171 = vmatprep.subr.mxu1 %v837_v46 }
 0x756   :  { %1172 = vmatpush3.msra.mxu1 %v837_v46 }
 0x757   :  { %1173 = vmatprep.subr.mxu1 %v836_v48 }
 0x758   :  { %1174 = vmatpush3.msra.mxu1 %v836_v48 }
 0x759   :  { %1175 = vmatprep.subr.mxu1 %v835_v49 }
 0x75a   :  { %1176 = vmatpush3.msra.mxu1 %v835_v49 }
 0x75b   :  { %1177 = vmatprep.subr.mxu1 %v834_v50 }
 0x75c   :  { %1178 = vmatpush3.msra.mxu1 %v834_v50 }
 0x75d   :  { %1179 = vmatprep.subr.mxu1 %v833_v22 }
 0x75e   :  { %1180 = vmatpush3.msra.mxu1 %v833_v22 }
 0x75f   :  { %1181 = vmatprep.subr.mxu1 %v832_v51 }
 0x760   :  { %1182 = vmatpush3.msra.mxu1 %v832_v51 }
 0x761   :  { %1183 = vmatprep.subr.mxu1 %v831_v52 }
 0x762   :  { %1184 = vmatpush3.msra.mxu1 %v831_v52 }
 0x763   :  { %1185 = vmatprep.subr.mxu1 %v830_v53 }
 0x764   :  { %1186 = vmatpush3.msra.mxu1 %v830_v53 }
 0x765   :  { %1187 = vmatprep.subr.mxu1 %v829_v54 }
 0x766   :  { %1188 = vmatpush3.msra.mxu1 %v829_v54 }
 0x767   :  { %1189 = vmatprep.subr.mxu1 %v828_v19 }
 0x768   :  { %1190 = vmatpush3.msra.mxu1 %v828_v19 }
 0x769   :  { %1191 = vmatprep.subr.mxu1 %v827_v55 }
 0x76a   :  { %1192 = vmatpush3.msra.mxu1 %v827_v55 }
 0x76b   :  { %1193 = vmatprep.subr.mxu1 %v826_v56 }
 0x76c   :  { %1194 = vmatpush3.msra.mxu1 %v826_v56 }
 0x76d   :  { %1195 = vmatprep.subr.mxu1 %v825_v57 }
 0x76e   :  { %1196 = vmatpush3.msra.mxu1 %v825_v57 }
 0x76f   :  { %1198 = vmatmul.mubr.f32.vlgmr.msra.gmra.mxu1 %v636_v33 }
 0x80f   :  { %v746_v62 = vpop.f32.mrf.mxu1 }
 0x810   :  { %v747_v63 = vadd.f32 %v746_v62, %v33_v61 }
 0x811   :  { %v1129_v0 = vpop.f32.mrf.mxu1 }
 0x812   :  { %v750_v1 = vmax.f32 %v747_v63, 0.0 }
 0x814   :  { %1163 = vmatmul.mubr.f32.vlgmr.msra.gmra.mxu0 %v750_v1 }
 0x82f   :  { %v1199_v7 = vpop.f32.mrf.mxu1 }
 0x830   :  { %v917_v8 = vadd.f32 %v1199_v7, %v844_v3 }
 0x831   :  { %v911_v9 = vpop.f32.mrf.mxu1 }
 0x832   :  { %921 = vst [vmem:[%s1390_s3 + $0x8] sm:$0xff] %v917_v8  ;;  %v912_v10 = vadd.f32 %v911_v9, %v844_v3 }
 0x834   :  { %920 = vst [vmem:[%s1390_s3] sm:$0xff] %v912_v10 }
 0x8d4   :  { %v820_v11 = vpop.f32.mrf.mxu0 }
 0x8d5   :  { %v821_v12 = vadd.f32 %v820_v11, %v752_v47 }
 0x8d6   :  { %v1164_v13 = vpop.f32.mrf.mxu0 }
 0x8d7   :  { %v824_v14 = vmax.f32 %v821_v12, 0.0 }
 0x8d9   :  { %v925_v6 = vrot.slane %v824_v14, %v129_v5 }
 0x8db   :  { %926 = vst [vmem:[%s1390_s3 + $0x10] sm:$0xff] %v925_v6 }
 0x8dc   :  { %931 = vsyncpa [#allocation3], 1 }

</bundles_post_ra>
